<compile_context>
chip_gen: v5e
topology: v5e:2x2
jax: 0.10.0
libtpu: 0.0.40
codegen_flags: <defaults>
</compile_context>

<pallas_src>
import functools

import jax
import jax.numpy as jnp
from jax.experimental import pallas as pl
from jax.experimental.pallas import tpu as pltpu


_VMEM_LIMIT = 40 * 1024 * 1024      # fits v7x's 64 MiB VMEM with headroom
_POOL_BYTES = 2 * 1024 * 1024       # ~input bytes per kernel-1 grid step
_SPATIAL_BYTES = 4 * 1024 * 1024    # ~im2col bytes per kernel-2 grid step


def _lane_tile(total, budget_elems):
    """Lane-axis tile: full extent if it fits the budget, else a 128-multiple."""
    if total <= budget_elems:
        return total, 1
    t = max(128, (budget_elems // 128) * 128)
    return t, pl.cdiv(total, t)


# ---------------------------------------------------------------------------
# Kernel 1: channel attention = global avg pool -> 1x1 conv -> ReLU -> 1x1 conv
#           -> sigmoid.  Tiled over H*W with an f32 running-sum accumulator.
# ---------------------------------------------------------------------------
def _attention_kernel(x_ref, w1_ref, b1_ref, w2_ref, b2_ref, scale_ref, acc_ref,
                      *, inv_hw, hw, thw, mask_tail):
    t = pl.program_id(1)

    @pl.when(t == 0)
    def _():
        acc_ref[...] = jnp.zeros_like(acc_ref)

    xv = x_ref[...].astype(jnp.float32)                       # (C, thw) tile
    if mask_tail:                                             # ragged last tile
        lane = jax.lax.broadcasted_iota(jnp.int32, xv.shape, 1) + t * thw
        xv = jnp.where(lane < hw, xv, 0.0)
    acc_ref[...] += jnp.sum(xv, axis=1, keepdims=True)

    @pl.when(t == pl.num_programs(1) - 1)
    def _():
        pooled = acc_ref[...] * inv_hw                                        # (C, 1)
        h = jnp.dot(w1_ref[...], pooled, preferred_element_type=jnp.float32)
        h = jnp.maximum(h + b1_ref[...], 0.0)                                 # ReLU
        z = jnp.dot(w2_ref[...], h, preferred_element_type=jnp.float32) + b2_ref[...]
        scale_ref[...] = jax.nn.sigmoid(z).astype(scale_ref.dtype)            # (C, 1)


# ---------------------------------------------------------------------------
# Kernel 2: fused attended conv + residual + BN + ReLU.
# Everything data-independent of the spatial tile is pre-folded into w/bias,
# so the body is a single MXU matmul with a lane-dense (spatial) output.
# ---------------------------------------------------------------------------
def _downsample_kernel(x_ref, w_ref, b_ref, o_ref):
    # x_ref: (K*K*C, TS) im2col tile, w_ref: (C_out, K*K*C), b_ref: (C_out, 1)
    y = jnp.dot(w_ref[...], x_ref[...], preferred_element_type=jnp.float32)
    o_ref[...] = jnp.maximum(y + b_ref[...], 0.0).astype(o_ref.dtype)


# ---------------------------------------------------------------------------
# Wrapper
# ---------------------------------------------------------------------------
@functools.partial(jax.jit, static_argnames=(
    "kernel_size", "stride", "padding", "mxu_dtype", "pool_tile", "spatial_tile"))
def attention_downsample(x_nchw, params, *, kernel_size=3, stride=2, padding=1,
                         mxu_dtype=None, pool_tile=None, spatial_tile=None):
    """AttentionDownsample forward.  mxu_dtype=jnp.bfloat16 is recommended on
    v7x (halves kernel-2 HBM traffic and VMEM block size)."""
    N, C, H, W = x_nchw.shape
    K, s, p = kernel_size, stride, padding
    C_mid = params["w1"].shape[1]
    C_out = params["conv_w"].shape[-1]
    Ho = (H + 2 * p - K) // s + 1
    Wo = (W + 2 * p - K) // s + 1
    # Residual (1x1 stride-s conv) must be expressible as the (p, p) tap of the
    # main conv and produce the same output size (true for the module defaults).
    assert 0 <= p < K, "padding must satisfy 0 <= padding < kernel_size"
    assert (H - 1) // s + 1 == Ho and (W - 1) // s + 1 == Wo, \
        "residual 1x1/stride conv output size must match the main conv"
    if mxu_dtype is None:
        mxu_dtype = x_nchw.dtype

    # ---- kernel 1: channel attention (native dtype, no staging passes) ------
    hw = H * W
    itemsize = x_nchw.dtype.itemsize
    if pool_tile is None:
        pool_tile = max(128, _POOL_BYTES // max(C * itemsize, 1))
    thw, n_hw = _lane_tile(hw, pool_tile)
    mask_tail = (hw % thw) != 0

    x_cw = x_nchw.reshape(N, C, hw)                              # free reshape

    w1t = params["w1"].astype(jnp.float32).T                     # (C_mid, C)
    b1c = params["b1"].astype(jnp.float32).reshape(C_mid, 1)
    w2t = params["w2"].astype(jnp.float32).T                     # (C, C_mid)
    b2c = params["b2"].astype(jnp.float32).reshape(C, 1)

    scale = pl.pallas_call(
        functools.partial(_attention_kernel, inv_hw=1.0 / float(hw),
                          hw=hw, thw=thw, mask_tail=mask_tail),
        out_shape=jax.ShapeDtypeStruct((N, C, 1), jnp.float32),
        grid=(N, n_hw),
        in_specs=[
            pl.BlockSpec((None, C, thw), lambda n, t: (n, 0, t)),
            pl.BlockSpec((C_mid, C), lambda n, t: (0, 0)),
            pl.BlockSpec((C_mid, 1), lambda n, t: (0, 0)),
            pl.BlockSpec((C, C_mid), lambda n, t: (0, 0)),
            pl.BlockSpec((C, 1), lambda n, t: (0, 0)),
        ],
        out_specs=pl.BlockSpec((None, C, 1), lambda n, t: (n, 0, 0)),
        scratch_shapes=[pltpu.VMEM((C, 1), jnp.float32)],
        compiler_params=pltpu.CompilerParams(
            dimension_semantics=("parallel", "arbitrary"),
            vmem_limit_bytes=_VMEM_LIMIT),
        cost_estimate=pl.CostEstimate(
            flops=2 * N * hw * C + 4 * N * C * C_mid,
            transcendentals=N * C,
            bytes_accessed=N * C * hw * itemsize + N * C * 4),
    )(x_cw, w1t, b1c, w2t, b2c)
    scale = scale.reshape(N, C)                                  # tiny

    # ---- fold attention scale, residual 1x1 conv and inference BN into the
    #      conv weights / bias (tiny (N, C_out, K*K*C) arrays, done in XLA) ---
    eps = 1e-5
    bn_a = params["bn_gamma"].astype(jnp.float32) / jnp.sqrt(
        params["bn_var"].astype(jnp.float32) + eps)              # (C_out,)
    bn_b = (params["bn_beta"].astype(jnp.float32)
            - params["bn_mean"].astype(jnp.float32) * bn_a)
    # conv_w is HWIO (K, K, C, C_out) -> (C_out, K*K*C); columns: (kh, kw) major, c minor
    w_main = jnp.transpose(params["conv_w"].astype(jnp.float32),
                           (3, 0, 1, 2)).reshape(C_out, K * K * C)
    scale_kkc = jnp.tile(scale, (1, K * K))                      # (N, K*K*C), c-minor repeat
    w_eff = w_main[None, :, :] * scale_kkc[:, None, :]           # (N, C_out, K*K*C)
    # residual 1x1/stride conv + BN fold into the (p, p) tap, un-scaled
    w_res = (params["res_w"].astype(jnp.float32) * bn_a[None, :]).T   # (C_out, C)
    tap = p * K + p
    w_eff = w_eff.at[:, :, tap * C:(tap + 1) * C].add(w_res[None, :, :])
    w_eff = w_eff.astype(mxu_dtype)
    bias = (params["conv_b"].astype(jnp.float32)
            + params["res_b"].astype(jnp.float32) * bn_a + bn_b).reshape(C_out, 1)

    # ---- stride-aware im2col staging (single XLA pass) ----------------------
    xs = x_nchw if x_nchw.dtype == mxu_dtype else x_nchw.astype(mxu_dtype)
    xp = jnp.pad(xs, ((0, 0), (0, 0), (p, p), (p, p)))
    taps = []
    for kh in range(K):
        for kw in range(K):
            taps.append(xp[:, :, kh:kh + (Ho - 1) * s + 1:s,
                               kw:kw + (Wo - 1) * s + 1:s])      # (N, C, Ho, Wo)
    xt = jnp.stack(taps, axis=1).reshape(N, K * K * C, Ho * Wo)  # spatial on lanes

    # ---- kernel 2: single matmul per spatial tile, output already NCHW ------
    S = Ho * Wo
    mx_itemsize = jnp.dtype(mxu_dtype).itemsize
    if spatial_tile is None:
        spatial_tile = max(128, _SPATIAL_BYTES // max(K * K * C * mx_itemsize, 1))
    ts, n_s = _lane_tile(S, spatial_tile)

    out_flat = pl.pallas_call(
        _downsample_kernel,
        out_shape=jax.ShapeDtypeStruct((N, C_out, S), x_nchw.dtype),
        grid=(N, n_s),
        in_specs=[
            pl.BlockSpec((None, K * K * C, ts), lambda n, t: (n, 0, t)),
            pl.BlockSpec((None, C_out, K * K * C), lambda n, t: (n, 0, 0)),
            pl.BlockSpec((C_out, 1), lambda n, t: (0, 0)),
        ],
        out_specs=pl.BlockSpec((None, C_out, ts), lambda n, t: (n, 0, t)),
        compiler_params=pltpu.CompilerParams(
            dimension_semantics=("parallel", "parallel"),
            vmem_limit_bytes=_VMEM_LIMIT),
        cost_estimate=pl.CostEstimate(
            flops=2 * N * S * K * K * C * C_out,
            transcendentals=0,
            bytes_accessed=(N * K * K * C * S * mx_itemsize
                            + N * C_out * S * itemsize
                            + N * C_out * (K * K * C + 1) * mx_itemsize)),
    )(xt, w_eff, bias)

    return out_flat.reshape(N, C_out, Ho, Wo)        # already NCHW, no transpose


# ---------------------------------------------------------------------------
# Pure-JAX reference (mirrors the PyTorch forward, NCHW) for verification
# ---------------------------------------------------------------------------
def reference(x_nchw, params, *, stride=2, padding=1):
    eps = 1e-5
    pooled = jnp.mean(x_nchw, axis=(2, 3))                       # (N, C)
    h = jax.nn.relu(pooled @ params["w1"] + params["b1"][0])
    s = jax.nn.sigmoid(h @ params["w2"] + params["b2"][0])       # (N, C)
    x_att = x_nchw * s[:, :, None, None]

    w_oihw = jnp.transpose(params["conv_w"], (3, 2, 0, 1))       # HWIO -> OIHW
    y = jax.lax.conv_general_dilated(
        x_att, w_oihw, (stride, stride), ((padding, padding), (padding, padding)),
        dimension_numbers=("NCHW", "OIHW", "NCHW"))
    y = y + params["conv_b"][None, :, None, None]

    wr_oihw = params["res_w"].T[:, :, None, None]                # (C_out, C, 1, 1)
    r = jax.lax.conv_general_dilated(
        x_nchw, wr_oihw, (stride, stride), ((0, 0), (0, 0)),
        dimension_numbers=("NCHW", "OIHW", "NCHW"))
    r = r + params["res_b"][None, :, None, None]
    r = (r - params["bn_mean"][None, :, None, None]) / jnp.sqrt(
        params["bn_var"] + eps)[None, :, None, None]
    r = r * params["bn_gamma"][None, :, None, None] + params["bn_beta"][None, :, None, None]
    return jax.nn.relu(y + r)


def make_params(key, C, C_out, K):
    C_mid = max(1, C // 4)
    ks = jax.random.split(key, 12)
    return {
        # channel attention: Conv2d(C, C//4, 1) then Conv2d(C//4, C, 1)
        "w1": 0.3 * jax.random.normal(ks[0], (C, C_mid), jnp.float32),
        "b1": 0.1 * jax.random.normal(ks[1], (1, C_mid), jnp.float32),
        "w2": 0.3 * jax.random.normal(ks[2], (C_mid, C), jnp.float32),
        "b2": 0.1 * jax.random.normal(ks[3], (1, C), jnp.float32),
        # main conv: Conv2d(C, C_out, K, stride=2, padding=1), stored HWIO
        "conv_w": 0.2 * jax.random.normal(ks[4], (K, K, C, C_out), jnp.float32),
        "conv_b": 0.1 * jax.random.normal(ks[5], (C_out,), jnp.float32),
        # residual: Conv2d(C, C_out, 1, stride=2) + BatchNorm2d(C_out)
        "res_w": 0.2 * jax.random.normal(ks[6], (C, C_out), jnp.float32),
        "res_b": 0.1 * jax.random.normal(ks[7], (C_out,), jnp.float32),
        "bn_gamma": 1.0 + 0.1 * jax.random.normal(ks[8], (C_out,), jnp.float32),
        "bn_beta": 0.1 * jax.random.normal(ks[9], (C_out,), jnp.float32),
        "bn_mean": 0.05 * jax.random.normal(ks[10], (C_out,), jnp.float32),
        "bn_var": 0.5 + jax.random.uniform(ks[11], (C_out,), jnp.float32),
    }


# ---------------------------------------------------------------------------
if __name__ == "__main__":
    key = jax.random.PRNGKey(0)
    k_p1, k_x1, k_p2, k_x2 = jax.random.split(key, 4)

    # --- shape 1: (2, 4, 16, 16) -> (2, 8, 8, 8) ------------------------------
    N, C, H, W, C_out, K = 2, 4, 16, 16, 8, 3
    params = make_params(k_p1, C, C_out, K)
    x = jax.random.normal(k_x1, (N, C, H, W), jnp.float32)
    ref = jax.block_until_ready(reference(x, params))

    out = jax.block_until_ready(attention_downsample(x, params))
    assert out.shape == (N, C_out, H // 2, W // 2), out.shape
    err = float(jnp.max(jnp.abs(out - ref)))
    assert jnp.allclose(out, ref, atol=1e-3, rtol=1e-3), err

    # forced tiny tiles: exercises the multi-tile pooled-sum accumulator path
    out_t = jax.block_until_ready(
        attention_downsample(x, params, pool_tile=128, spatial_tile=128))
    err_t = float(jnp.max(jnp.abs(out_t - ref)))
    assert jnp.allclose(out_t, ref, atol=1e-3, rtol=1e-3), err_t

    # bf16 MXU operands for the fused conv (f32 accumulation, f32 attention)
    out_bf = jax.block_until_ready(
        attention_downsample(x, params, mxu_dtype=jnp.bfloat16))
    err_bf = float(jnp.max(jnp.abs(out_bf - ref)))
    assert jnp.allclose(out_bf, ref, atol=5e-2, rtol=5e-2), err_bf

    # --- shape 2: ragged (1, 8, 36, 22): masked pooling tail + partial
    #     (OOB-write-dropped) spatial tiles ------------------------------------
    N2, C2, H2, W2, C_out2 = 1, 8, 36, 22, 16
    params2 = make_params(k_p2, C2, C_out2, K)
    x2 = jax.random.normal(k_x2, (N2, C2, H2, W2), jnp.float32)
    ref2 = jax.block_until_ready(reference(x2, params2))
    out2 = jax.block_until_ready(
        attention_downsample(x2, params2, pool_tile=128, spatial_tile=128))
    assert out2.shape == ref2.shape, (out2.shape, ref2.shape)
    err2 = float(jnp.max(jnp.abs(out2 - ref2)))
    assert jnp.allclose(out2, ref2, atol=1e-3, rtol=1e-3), err2

    print("KERNEL_OK")
</pallas_src>

<mosaic_0001>
module attributes {stable_mosaic.version = 11 : i64} {
  func.func @_attention_kernel(%arg0: i32, %arg1: i32, %arg2: memref<1x4x256xf32, #tpu.memory_space<vmem>>, %arg3: memref<1x4xf32, #tpu.memory_space<vmem>>, %arg4: memref<1x1xf32, #tpu.memory_space<vmem>>, %arg5: memref<4x1xf32, #tpu.memory_space<vmem>>, %arg6: memref<4x1xf32, #tpu.memory_space<vmem>>, %arg7: memref<1x4x1xf32, #tpu.memory_space<vmem>>, %arg8: memref<4x1xf32, #tpu.memory_space<vmem>>) attributes {dimension_semantics = [#tpu.dimension_semantics<parallel>, #tpu.dimension_semantics<arbitrary>], iteration_bounds = array<i64: 2, 1>, scalar_prefetch = 0 : i64, scratch_operands = 1 : i64, tpu.core_type = #tpu.core_type<tc>, window_params = [{transform_indices = @transform_0, window_bounds = array<i64: 1, 4, 256>}, {pipeline_mode = #tpu.pipeline_mode<synchronous>, transform_indices = @transform_1, window_bounds = array<i64: 1, 4>}, {pipeline_mode = #tpu.pipeline_mode<synchronous>, transform_indices = @transform_2, window_bounds = array<i64: 1, 1>}, {pipeline_mode = #tpu.pipeline_mode<synchronous>, transform_indices = @transform_3, window_bounds = array<i64: 4, 1>}, {pipeline_mode = #tpu.pipeline_mode<synchronous>, transform_indices = @transform_4, window_bounds = array<i64: 4, 1>}, {transform_indices = @transform_5, window_bounds = array<i64: 1, 4, 1>}]} {
    %c0_i32 = arith.constant 0 : i32
    %0 = arith.cmpi eq, %arg1, %c0_i32 : i32
    %1 = arith.extui %0 : i1 to i32
    %c0_i32_0 = arith.constant 0 : i32
    %2 = arith.cmpi ne, %1, %c0_i32_0 : i32
    scf.if %2 {
      %cst_9 = arith.constant 0.000000e+00 : f32
      %13 = vector.broadcast %cst_9 : f32 to vector<4x1xf32>
      %c0_10 = arith.constant 0 : index
      %c0_11 = arith.constant 0 : index
      %14 = vector.load %arg8[%c0_10, %c0_11] : memref<4x1xf32, #tpu.memory_space<vmem>>, vector<4x1xf32>
      tpu.vector_store %arg8[%c0_10, %c0_11], %13 {strides = array<i32>} : memref<4x1xf32, #tpu.memory_space<vmem>>, vector<4x1xf32>,
    } else {
    }
    %c0 = arith.constant 0 : index
    %c0_1 = arith.constant 0 : index
    %c0_2 = arith.constant 0 : index
    %3 = vector.load %arg2[%c0, %c0_1, %c0_2] : memref<1x4x256xf32, #tpu.memory_space<vmem>>, vector<1x4x256xf32>
    %4 = vector.shape_cast %3 : vector<1x4x256xf32> to vector<4x256xf32>
    %c0_3 = arith.constant 0 : index
    %c0_4 = arith.constant 0 : index
    %5 = vector.load %arg8[%c0_3, %c0_4] : memref<4x1xf32, #tpu.memory_space<vmem>>, vector<4x1xf32>
    %cst = arith.constant dense<0.000000e+00> : vector<4xf32>
    %6 = vector.multi_reduction <add>, %4, %cst [1] : vector<4x256xf32> to vector<4xf32>
    %7 = vector.shape_cast %6 : vector<4xf32> to vector<4x1xf32>
    %8 = arith.addf %5, %7 : vector<4x1xf32>
    %c0_5 = arith.constant 0 : index
    %c0_6 = arith.constant 0 : index
    %9 = vector.load %arg8[%c0_5, %c0_6] : memref<4x1xf32, #tpu.memory_space<vmem>>, vector<4x1xf32>
    tpu.vector_store %arg8[%c0_5, %c0_6], %8 {strides = array<i32>} : memref<4x1xf32, #tpu.memory_space<vmem>>, vector<4x1xf32>,
    %c0_i32_7 = arith.constant 0 : i32
    %10 = arith.cmpi eq, %arg1, %c0_i32_7 : i32
    %11 = arith.extui %10 : i1 to i32
    %c0_i32_8 = arith.constant 0 : i32
    %12 = arith.cmpi ne, %11, %c0_i32_8 : i32
    scf.if %12 {
      %c0_9 = arith.constant 0 : index
      %c0_10 = arith.constant 0 : index
      %13 = vector.load %arg8[%c0_9, %c0_10] : memref<4x1xf32, #tpu.memory_space<vmem>>, vector<4x1xf32>
      %cst_11 = arith.constant 3.906250e-03 : f32
      %14 = vector.broadcast %cst_11 : f32 to vector<4x1xf32>
      %15 = arith.mulf %13, %14 : vector<4x1xf32>
      %c0_12 = arith.constant 0 : index
      %c0_13 = arith.constant 0 : index
      %16 = vector.load %arg3[%c0_12, %c0_13] : memref<1x4xf32, #tpu.memory_space<vmem>>, vector<1x4xf32>
      %cst_14 = arith.constant dense<0.000000e+00> : vector<1x1xf32>
      %17 = tpu.matmul %16, %15, %cst_14 {dimension_numbers = #tpu.dot_dimension_numbers<[1], [0], [0], [1], [0, 0, 1, 1], [], []>} : vector<1x4xf32>, vector<4x1xf32>, vector<1x1xf32> -> vector<1x1xf32>
      %c0_15 = arith.constant 0 : index
      %c0_16 = arith.constant 0 : index
      %18 = vector.load %arg4[%c0_15, %c0_16] : memref<1x1xf32, #tpu.memory_space<vmem>>, vector<1x1xf32>
      %19 = arith.addf %17, %18 : vector<1x1xf32>
      %cst_17 = arith.constant 0.000000e+00 : f32
      %20 = vector.broadcast %cst_17 : f32 to vector<1x1xf32>
      %21 = arith.maximumf %19, %20 : vector<1x1xf32>
      %c0_18 = arith.constant 0 : index
      %c0_19 = arith.constant 0 : index
      %22 = vector.load %arg5[%c0_18, %c0_19] : memref<4x1xf32, #tpu.memory_space<vmem>>, vector<4x1xf32>
      %cst_20 = arith.constant dense<0.000000e+00> : vector<4x1xf32>
      %23 = tpu.matmul %22, %21, %cst_20 {dimension_numbers = #tpu.dot_dimension_numbers<[1], [0], [0], [1], [0, 0, 1, 1], [], []>} : vector<4x1xf32>, vector<1x1xf32>, vector<4x1xf32> -> vector<4x1xf32>
      %c0_21 = arith.constant 0 : index
      %c0_22 = arith.constant 0 : index
      %24 = vector.load %arg6[%c0_21, %c0_22] : memref<4x1xf32, #tpu.memory_space<vmem>>, vector<4x1xf32>
      %25 = arith.addf %23, %24 : vector<4x1xf32>
      %26 = arith.negf %25 : vector<4x1xf32>
      %27 = math.exp %26 : vector<4x1xf32>
      %cst_23 = arith.constant 1.000000e+00 : f32
      %28 = vector.broadcast %cst_23 : f32 to vector<4x1xf32>
      %29 = arith.addf %28, %27 : vector<4x1xf32>
      %30 = arith.divf %28, %29 : vector<4x1xf32>
      %c0_24 = arith.constant 0 : index
      %c0_25 = arith.constant 0 : index
      %c0_26 = arith.constant 0 : index
      %31 = vector.load %arg7[%c0_24, %c0_25, %c0_26] : memref<1x4x1xf32, #tpu.memory_space<vmem>>, vector<1x4x1xf32>
      %32 = vector.shape_cast %31 : vector<1x4x1xf32> to vector<4x1xf32>
      %33 = vector.shape_cast %30 : vector<4x1xf32> to vector<1x4x1xf32>
      tpu.vector_store %arg7[%c0_24, %c0_25, %c0_26], %33 {strides = array<i32>} : memref<1x4x1xf32, #tpu.memory_space<vmem>>, vector<1x4x1xf32>,
    } else {
    }
    return
  }
  func.func @transform_0(%arg0: i32, %arg1: i32) -> (i32, i32, i32) {
    %c0_i32 = arith.constant 0 : i32
    %c0_i32_0 = arith.constant 0 : i32
    return %arg0, %c0_i32, %arg1 : i32, i32, i32
  }
  func.func @transform_1(%arg0: i32, %arg1: i32) -> (i32, i32) {
    %c0_i32 = arith.constant 0 : i32
    %c0_i32_0 = arith.constant 0 : i32
    %c0_i32_1 = arith.constant 0 : i32
    return %c0_i32, %c0_i32_0 : i32, i32
  }
  func.func @transform_2(%arg0: i32, %arg1: i32) -> (i32, i32) {
    %c0_i32 = arith.constant 0 : i32
    %c0_i32_0 = arith.constant 0 : i32
    %c0_i32_1 = arith.constant 0 : i32
    return %c0_i32, %c0_i32_0 : i32, i32
  }
  func.func @transform_3(%arg0: i32, %arg1: i32) -> (i32, i32) {
    %c0_i32 = arith.constant 0 : i32
    %c0_i32_0 = arith.constant 0 : i32
    %c0_i32_1 = arith.constant 0 : i32
    return %c0_i32, %c0_i32_0 : i32, i32
  }
  func.func @transform_4(%arg0: i32, %arg1: i32) -> (i32, i32) {
    %c0_i32 = arith.constant 0 : i32
    %c0_i32_0 = arith.constant 0 : i32
    %c0_i32_1 = arith.constant 0 : i32
    return %c0_i32, %c0_i32_0 : i32, i32
  }
  func.func @transform_5(%arg0: i32, %arg1: i32) -> (i32, i32, i32) {
    %c0_i32 = arith.constant 0 : i32
    %c0_i32_0 = arith.constant 0 : i32
    %c0_i32_1 = arith.constant 0 : i32
    return %arg0, %c0_i32, %c0_i32_0 : i32, i32, i32
  }
}

module attributes {stable_mosaic.version = 11 : i64} {
  func.func @_downsample_kernel(%arg0: i32, %arg1: i32, %arg2: memref<1x36x64xf32, #tpu.memory_space<vmem>>, %arg3: memref<1x8x36xf32, #tpu.memory_space<vmem>>, %arg4: memref<8x1xf32, #tpu.memory_space<vmem>>, %arg5: memref<1x8x64xf32, #tpu.memory_space<vmem>>) attributes {dimension_semantics = [#tpu.dimension_semantics<parallel>, #tpu.dimension_semantics<parallel>], iteration_bounds = array<i64: 2, 1>, scalar_prefetch = 0 : i64, scratch_operands = 0 : i64, tpu.core_type = #tpu.core_type<tc>, window_params = [{transform_indices = @transform_0, window_bounds = array<i64: 1, 36, 64>}, {transform_indices = @transform_1, window_bounds = array<i64: 1, 8, 36>}, {pipeline_mode = #tpu.pipeline_mode<synchronous>, transform_indices = @transform_2, window_bounds = array<i64: 8, 1>}, {transform_indices = @transform_3, window_bounds = array<i64: 1, 8, 64>}]} {
    %c0 = arith.constant 0 : index
    %c0_0 = arith.constant 0 : index
    %c0_1 = arith.constant 0 : index
    %0 = vector.load %arg3[%c0, %c0_0, %c0_1] : memref<1x8x36xf32, #tpu.memory_space<vmem>>, vector<1x8x36xf32>
    %1 = vector.shape_cast %0 : vector<1x8x36xf32> to vector<8x36xf32>
    %c0_2 = arith.constant 0 : index
    %c0_3 = arith.constant 0 : index
    %c0_4 = arith.constant 0 : index
    %2 = vector.load %arg2[%c0_2, %c0_3, %c0_4] : memref<1x36x64xf32, #tpu.memory_space<vmem>>, vector<1x36x64xf32>
    %3 = vector.shape_cast %2 : vector<1x36x64xf32> to vector<36x64xf32>
    %cst = arith.constant dense<0.000000e+00> : vector<8x64xf32>
    %4 = tpu.matmul %1, %3, %cst {dimension_numbers = #tpu.dot_dimension_numbers<[1], [0], [0], [1], [0, 0, 1, 1], [], []>} : vector<8x36xf32>, vector<36x64xf32>, vector<8x64xf32> -> vector<8x64xf32>
    %c0_5 = arith.constant 0 : index
    %c0_6 = arith.constant 0 : index
    %5 = vector.load %arg4[%c0_5, %c0_6] : memref<8x1xf32, #tpu.memory_space<vmem>>, vector<8x1xf32>
    %6 = vector.broadcast %5 : vector<8x1xf32> to vector<8x64xf32>
    %7 = arith.addf %4, %6 : vector<8x64xf32>
    %cst_7 = arith.constant 0.000000e+00 : f32
    %8 = vector.broadcast %cst_7 : f32 to vector<8x64xf32>
    %9 = arith.maximumf %7, %8 : vector<8x64xf32>
    %c0_8 = arith.constant 0 : index
    %c0_9 = arith.constant 0 : index
    %c0_10 = arith.constant 0 : index
    %10 = vector.load %arg5[%c0_8, %c0_9, %c0_10] : memref<1x8x64xf32, #tpu.memory_space<vmem>>, vector<1x8x64xf32>
    %11 = vector.shape_cast %10 : vector<1x8x64xf32> to vector<8x64xf32>
    %12 = vector.shape_cast %9 : vector<8x64xf32> to vector<1x8x64xf32>
    tpu.vector_store %arg5[%c0_8, %c0_9, %c0_10], %12 {strides = array<i32>} : memref<1x8x64xf32, #tpu.memory_space<vmem>>, vector<1x8x64xf32>,
    return
  }
  func.func @transform_0(%arg0: i32, %arg1: i32) -> (i32, i32, i32) {
    %c0_i32 = arith.constant 0 : i32
    %c0_i32_0 = arith.constant 0 : i32
    return %arg0, %c0_i32, %arg1 : i32, i32, i32
  }
  func.func @transform_1(%arg0: i32, %arg1: i32) -> (i32, i32, i32) {
    %c0_i32 = arith.constant 0 : i32
    %c0_i32_0 = arith.constant 0 : i32
    %c0_i32_1 = arith.constant 0 : i32
    return %arg0, %c0_i32, %c0_i32_0 : i32, i32, i32
  }
  func.func @transform_2(%arg0: i32, %arg1: i32) -> (i32, i32) {
    %c0_i32 = arith.constant 0 : i32
    %c0_i32_0 = arith.constant 0 : i32
    %c0_i32_1 = arith.constant 0 : i32
    return %c0_i32, %c0_i32_0 : i32, i32
  }
  func.func @transform_3(%arg0: i32, %arg1: i32) -> (i32, i32, i32) {
    %c0_i32 = arith.constant 0 : i32
    %c0_i32_0 = arith.constant 0 : i32
    return %arg0, %c0_i32, %arg1 : i32, i32, i32
  }
}

</mosaic_0001>

<bundles_post_ra>
// kernel: mul.15
= control target key start
LH: loop header
LB: loop body
LE: loop exit
PB: predicated region body
PF: predicated region fallthrough
CT: control target
= control target key end

     0   :  { %vm39_vm0 = vcmask 64512   ;;  %s170_s0 = inlined_call_operand.vmem [shape: f32[8,3,3,4], index: 0, kind: input, shape index: {}]   ;;  %s171_s1 = inlined_call_operand.vmem [shape: f32[8,36], index: 1, kind: output, shape index: {}]  }
   0x1   :  { %v81_v0 = vld [vmem:[%s170_s0 + $0x20] sm:$0xf]  ;;  %v82_v1 = vld [vmem:[%s170_s0 + $0x1c] sm:$0xf]  ;;  %v83_v2 = vld [vmem:[%s170_s0 + $0x18] sm:$0xf] }
   0x2   :  { %7 = vst [vmem:[#allocation0 + $0x10] sm:$0xf] %v81_v0  ;;  %v84_v3 = vld [vmem:[%s170_s0 + $0x14] sm:$0xf]  ;;  %v85_v4 = vld [vmem:[%s170_s0 + $0x10] sm:$0xf] }
   0x3   :  { %11 = vst [vmem:[#allocation0 + $0x40] sm:$0xf] %v82_v1  ;;  %v86_v5 = vld [vmem:[%s170_s0 + $0xc] sm:$0xf]  ;;  %v87_v6 = vld [vmem:[%s170_s0 + $0x8] sm:$0xf] }
   0x4   :  { %15 = vst [vmem:[#allocation0 + $0x28] sm:$0xf] %v83_v2  ;;  %v88_v7 = vld [vmem:[%s170_s0 + $0x4] sm:$0xf]  ;;  %v36_v8 = vld [vmem:[%s170_s0] sm:$0xf] }
   0x5   :  { %19 = vst [vmem:[#allocation0 + $0x30] sm:$0xf] %v84_v3 }
   0x6   :  { %23 = vst [vmem:[#allocation0 + $0x20] sm:$0xf] %v85_v4 }
   0x7   :  { %27 = vst [vmem:[#allocation0 + $0x18] sm:$0xf] %v86_v5 }
   0x8   :  { %31 = vst [vmem:[#allocation0] sm:$0xf] %v87_v6 }
   0x9   :  { %35 = vst [vmem:[#allocation0 + $0x8] sm:$0xf] %v88_v7  ;;  %v77_v16 = vld [vmem:[#allocation0 + $0x10] sm:$0xf]  }
   0xa   :  { %37 = vst [vmem:[#allocation0 + $0x38] sm:$0xf] %v36_v8  ;;  %v72_v9 = vld [vmem:[#allocation0 + $0x40] sm:$0xf]  }
   0xb   :  { %v67_v10 = vld [vmem:[#allocation0 + $0x28] sm:$0xf]   ;;  %95 = vst.msk [vmem:[%s171_s1 + $0x1c] sm:$0xf] %vm39_vm0, %v72_v9  }
   0xc   :  { %v62_v11 = vld [vmem:[#allocation0 + $0x30] sm:$0xf]   ;;  %94 = vst.msk [vmem:[%s171_s1 + $0x18] sm:$0xf] %vm39_vm0, %v67_v10  }
   0xd   :  { %v57_v12 = vld [vmem:[#allocation0 + $0x20] sm:$0xf]   ;;  %93 = vst.msk [vmem:[%s171_s1 + $0x14] sm:$0xf] %vm39_vm0, %v62_v11  }
   0xe   :  { %v52_v13 = vld [vmem:[#allocation0 + $0x18] sm:$0xf]   ;;  %92 = vst.msk [vmem:[%s171_s1 + $0x10] sm:$0xf] %vm39_vm0, %v57_v12  }
   0xf   :  { %v47_v14 = vld [vmem:[#allocation0] sm:$0xf]   ;;  %91 = vst.msk [vmem:[%s171_s1 + $0xc] sm:$0xf] %vm39_vm0, %v52_v13  }
  0x10   :  { %v42_v15 = vld [vmem:[#allocation0 + $0x8] sm:$0xf]   ;;  %90 = vst.msk [vmem:[%s171_s1 + $0x8] sm:$0xf] %vm39_vm0, %v47_v14  }
  0x11   :  { %v38_v17 = vld [vmem:[#allocation0 + $0x38] sm:$0xf]   ;;  %89 = vst.msk [vmem:[%s171_s1 + $0x4] sm:$0xf] %vm39_vm0, %v42_v15  }
  0x12   :  { %40 = vst.msk [vmem:[%s171_s1] sm:$0xf] %vm39_vm0, %v38_v17  }
  0x13   :  { %96 = vst.msk [vmem:[%s171_s1 + $0x20] sm:$0xf] %vm39_vm0, %v77_v16  }

// kernel: attention_downsample.2
= control target key start
LH: loop header
LB: loop body
LE: loop exit
PB: predicated region body
PF: predicated region fallthrough
CT: control target
= control target key end

     0   :  { %s531_s20 = smov 0   ;;  %s533_s21 = smov 0   ;;  %s580_s0 = inlined_call_operand.vmem [shape: f32[2,4,256], index: 0, kind: input, shape index: {}]   ;;  %s581_s1 = inlined_call_operand.vmem [shape: f32[1,4], index: 1, kind: input, shape index: {}]   ;;  %s582_s2 = inlined_call_operand.<no memory space> [shape: f32[1,1], index: 2, kind: input, shape index: {}]   ;;  %s583_s3 = inlined_call_operand.vmem [shape: f32[4,1], index: 3, kind: input, shape index: {}]   ;;  %s584_s4 = inlined_call_operand.vmem [shape: f32[4,1], index: 4, kind: input, shape index: {}]   ;;  %s585_s5 = inlined_call_operand.vmem [shape: f32[2,4,1], index: 5, kind: output, shape index: {}]  }
   0x1   :  { %v10_v0 = vstv %s582_s2  ;;  %s535_s22 = smov 0  }
   0x2   :  { %11 = vst [vmem:[#allocation3] sm:$0x1] %v10_v0 }
   0x3 LB: > { %s29_s2 = sadd.s32 1, %s491_s21  ;;  %p432_p0 = scmp.ge.s32.totalorder %s495_s22, 1  ;;  %s495_s22 = sphi %s535_s22, %s17_s22   ;;  %s491_s21 = sphi %s533_s21, %s587_s21   ;;  %s487_s20 = sphi %s531_s20, %s586_s20  }
   0x4   : > { %p31_p1 = scmp.ge.s32.totalorder %s29_s2, 2  ;;  %p208_p2 = scmp.lt.s32.totalorder %s495_s22, 3 }
   0x6   : > { %s589_s2 = smov (%p31_p1, %s29_s2), 0  ;;  %p209_p3 = pnand %p432_p0, %p208_p2 }
   0x7   : > { %p240_p4 = scmp.lt.s32.totalorder (!%p209_p3), %s487_s20, 1 }
   0x8   : > { %212 = sbr.rel (%p209_p3) target bundleno = 445 (0x1bd), region = 40 }
   0xd   : > { %vm257_vm0 = vcmask 3072   ;;  %v497_v1 = vmov 0.0   ;;  %s591_s20 = smov (!%p240_p4, %s487_s20), 1  ;;  %vm267_vm1 = vcmask 1043456   ;;  %v281_v13 = vld [vmem:[%s581_s1] sm:$0x1] }
   0xe   : > { %258 = vst.msk [vmem:[#allocation2] sm:$0xf] %vm257_vm0, %v497_v1  ;;  %s443_s23 = sshll.u32 %s591_s20, 3  ;;  %vm283_vm2 = vcmask 31744   ;;  %v282_v14 = vld [vmem:[#allocation3] sm:$0x1] }
   0xf   : > { %s247_s26 = scalar_lea.vmem %s580_s0, %s443_s23  ;;  %vm317_vm3 = vcmask 1040384   ;;  %v311_v18 = vld [vmem:[%s583_s3] sm:$0xf]  ;;  %vm313_vm4 = vcmask 7168   ;;  %s435_s8 = sshll.u32 %s591_s20, 2 }
  0x10   : > { %v259_v2 = vld [vmem:[%s247_s26] sm:$0xff]  ;;  %s252_s11 = scalar_lea.vmem %s585_s5, %s435_s8 }
  0x11   : > { %262 = vst [vmem:[#allocation1] ss:$2 sm:$0xff] %v259_v2  ;;  %v312_v19 = vld [vmem:[%s584_s4] sm:$0xf] }
  0x15   : > { %v260_v8 = vld [vmem:[#allocation2] sm:$0xf] }
  0x18   : > { %v263_v3 = vld.sshfl [vmem:[#allocation1] sm:$0xff pattern:$0x75316420]  ;;  %v264_v4 = vld.sshfl [vmem:[#allocation1 + $0x8] sm:$0xff pattern:$0x75316420] }
  0x19   : > { %v268_v5 = vsel %vm267_vm1, %v263_v3, 0.0  ;;  %v269_v6 = vsel %vm267_vm1, %v264_v4, 0.0 }
  0x1a   : > { %v270_v7 = vadd.f32 %v269_v6, %v268_v5 }
  0x1c   : > { %271 = vadd.xlane.f32.xlu0 %v270_v7 }
  0x8f   : > { %v272_v9 = vpop.xlane.xlu0 %271 }
  0x90   : > { %v273_v10 = vadd.f32 %v272_v9, %v260_v8 }
  0x92   : > { %275 = vst.msk [vmem:[#allocation2] sm:$0xf] %vm257_vm0, %v273_v10 }
  0x99   : > { %v279_v11 = vld [vmem:[#allocation2] sm:$0xf] }
  0x9a   : > { %v280_v12 = vmul.f32 0.00390625, %v279_v11 }
  0x9c   : > { %436 = vmatpush.msk.msra.mxu0 %vm267_vm1, %v280_v12 }
  0x9d   : > { %437 = vmatmul.msk.f32.vlgmr.msra.gmra.mxu0 %vm283_vm2, %v281_v13 }
 0x11a   : > { %v307_v15 = vpop.f32.mrf.mxu0 }
 0x11b   : > { %v308_v16 = vadd.f32 %v307_v15, %v282_v14 }
 0x11d   : > { %v310_v17 = vmax.f32 %v308_v16, 0.0 }
 0x11f   : > { %438 = vmatpush.msk.msra.mxu1 %vm317_vm3, %v310_v17 }
 0x120   : > { %439 = vmatmul.msk.f32.vlgmr.msra.gmra.mxu1 %vm313_vm4, %v311_v18 }
 0x19d   : > { %v338_v20 = vpop.f32.mrf.mxu1 }
 0x19e   : > { %v339_v21 = vadd.f32 %v338_v20, %v312_v19 }
 0x1a0   : > { %v440_v22 = vmul.f32 -1.442695, %v339_v21 }
 0x1a2   : > { %469 = vpow2.f32 %v440_v22 }
 0x1a8   : > { %v470_v23 = vpop.eup %469 }
 0x1a9   : > { %v344_v24 = vadd.f32 1.0, %v470_v23 }
 0x1ab   : > { %471 = vrcp.f32 %v344_v24  ;;  %v356_v28 = vand.u32 2147483648, %v344_v24  ;;  %v354_v30 = vand.u32 2147483647, %v344_v24  ;;  %vm350_vm6 = vweird.f32 %v344_v24 }
 0x1ad   : > { %v357_v32 = vor.u32 1.1754944e-38, %v356_v28  ;;  %vm355_vm8 = vcmp.eq.f32.partialorder %v354_v30, 8.507059e+37 }
 0x1b1   : > { %v472_v25 = vpop.eup %471 }
 0x1b2   : > { %v346_v26 = vmul.f32 %v472_v25, %v344_v24  ;;  %vm351_vm5 = vweird.f32 %v472_v25 }
 0x1b3   : > { %vm352_vm7 = vmor %vm350_vm6, %vm351_vm5 }
 0x1b4   : > { %v347_v27 = vsub.f32 1.0, %v346_v26 }
 0x1b6   : > { %v348_v29 = vmul.f32 %v472_v25, %v347_v27 }
 0x1b8   : > { %v349_v31 = vadd.f32 %v472_v25, %v348_v29 }
 0x1ba   : > { %v353_v33 = vsel %vm352_vm7, %v472_v25, %v349_v31 }
 0x1bb   : > { %v358_v34 = vsel %vm355_vm8, %v357_v32, %v353_v33 }
 0x1bc   : > { %360 = vst.msk [vmem:[%s252_s11] sm:$0xf] %vm257_vm0, %v358_v34 }
 0x1bd PF: > { %s17_s22 = sadd.s32 1, %s495_s22   ;;  %s586_s20 = smov %s491_s21 }
 0x1be   : > { %p14_p5 = scmp.ge.s32.totalorder %s17_s22, 4   ;;  %s587_s21 = smov %s589_s2 }
 0x1c0   :  { %16 = sbr.rel (!%p14_p5) target bundleno = 3 (0x3), region = 78 }

// kernel: attention_downsample.3
= control target key start
LH: loop header
LB: loop body
LE: loop exit
PB: predicated region body
PF: predicated region fallthrough
CT: control target
= control target key end

     0   :  { %s433_s12 = smov 0   ;;  %s435_s13 = smov 0   ;;  %s472_s0 = inlined_call_operand.vmem [shape: f32[2,36,64], index: 0, kind: input, shape index: {}]   ;;  %s473_s1 = inlined_call_operand.vmem [shape: f32[2,8,36], index: 1, kind: input, shape index: {}]   ;;  %s474_s2 = inlined_call_operand.vmem [shape: f32[8,1], index: 2, kind: input, shape index: {}]   ;;  %s475_s3 = inlined_call_operand.vmem [shape: f32[2,8,64], index: 3, kind: output, shape index: {}]  }
   0x1   :  { %s437_s14 = smov 0  }
   0x2 LB: > { %s25_s15 = sadd.s32 1, %s406_s13  ;;  %p353_p0 = scmp.ge.s32.totalorder %s410_s14, 1  ;;  %s410_s14 = sphi %s437_s14, %s13_s14   ;;  %s406_s13 = sphi %s435_s13, %s477_s13   ;;  %s402_s12 = sphi %s433_s12, %s476_s12  }
   0x3   : > { %p27_p1 = scmp.ge.s32.totalorder %s25_s15, 2  ;;  %p165_p2 = scmp.lt.s32.totalorder %s410_s14, 3 }
   0x5   : > { %s479_s15 = smov (%p27_p1, %s25_s15), 0  ;;  %p166_p3 = pnand %p353_p0, %p165_p2 }
   0x6   : > { %p198_p4 = scmp.lt.s32.totalorder (!%p166_p3), %s402_s12, 1 }
   0x7   : > { %169 = sbr.rel (%p166_p3) target bundleno = 157 (0x9d), region = 32 }
   0xc   : > { %v223_v0 = vld [vmem:[%s474_s2] sm:$0xff]  ;;  %v412_v1 = vmov 0   ;;  %s481_s12 = smov (!%p198_p4, %s402_s12), 1  ;;  %vm233_vm0 = vcmask 1043456   ;;  %vm229_vm1 = vcmask 293888   ;;  %vm258_vm2 = vcmask 523264  }
   0xd   : > { %387 = vset.pattern.permute.xlu0 %v412_v1  ;;  %s361_s18 = smul.u32 40, %s481_s12  ;;  %s355_s22 = sshll.u32 %s481_s12, 3 }
   0xe   : > { %226 = vperm.xlu0 %387, %v223_v0   ;;  %s209_s25 = scalar_lea.vmem %s473_s1, %s355_s22  ;;  %s216_s28 = scalar_lea.vmem %s475_s3, %s355_s22 }
   0xf   : > { %s205_s21 = scalar_lea.vmem %s472_s0, %s361_s18  ;;  %v217_v7 = vld [vmem:[%s209_s25] sm:$0xff] }
  0x10   : > { %v222_v2 = vld [vmem:[%s205_s21 + $0x20] sm:$0xf]  ;;  %v221_v3 = vld [vmem:[%s205_s21 + $0x18] sm:$0xff]  ;;  %v220_v4 = vld [vmem:[%s205_s21 + $0x10] sm:$0xff] }
  0x11   : > { %357 = vmatpush.msk.msra.mxu0 %vm233_vm0, %v222_v2  ;;  %v219_v5 = vld [vmem:[%s205_s21 + $0x8] sm:$0xff]  ;;  %v218_v6 = vld [vmem:[%s205_s21] sm:$0xff] }
  0x13   : > { %249 = vmatpush.msra.mxu0 %v221_v3 }
  0x15   : > { %250 = vmatpush.msra.mxu0 %v220_v4 }
  0x17   : > { %251 = vmatpush.msra.mxu0 %v219_v5 }
  0x19   : > { %252 = vmatpush.msra.mxu0 %v218_v6 }
  0x1a   : > { %358 = vmatmul.msk.f32.vlgmr.msra.gmra.mxu0 %vm229_vm1, %v217_v7 }
  0x80   : > { %v227_v8 = vpop.permute.xlu0 %226 }
  0x97   : > { %v254_v9 = vpop.f32.mrf.mxu0 }
  0x98   : > { %v255_v10 = vadd.f32 %v254_v9, %v227_v8 }
  0x9a   : > { %v257_v11 = vmax.f32 %v255_v10, 0.0 }
  0x9c   : > { %259 = vst.msk [vmem:[%s216_s28] sm:$0xff] %vm258_vm2, %v257_v11 }
  0x9d PF: > { %s13_s14 = sadd.s32 1, %s410_s14   ;;  %s476_s12 = smov %s406_s13 }
  0x9e   : > { %p10_p5 = scmp.ge.s32.totalorder %s13_s14, 4   ;;  %s477_s13 = smov %s479_s15 }
  0xa0   :  { %12 = sbr.rel (!%p10_p5) target bundleno = 2 (0x2), region = 65 }

</bundles_post_ra>
